<compile_context>
chip_gen: v7x
topology: tpu7x:2x2x1
jax: 0.10.0
libtpu: 0.0.40
codegen_flags: <defaults>
</compile_context>

<pallas_src>
import functools

import jax
import jax.numpy as jnp
from jax.experimental import pallas as pl
from jax.experimental.pallas import tpu as pltpu

LANES = 128


def _accuracy_kernel(preds_ref, targets_ref, partial_ref, *, batch, block_batch):
    """One batch tile: partial = #valid rows where argmax(preds, -1) == target."""
    preds = preds_ref[...]                # (TB, C) float
    tgt = targets_ref[...]                # (TB, 1) int32
    tb, num_classes = preds.shape

    # First-occurrence argmax over the class axis (matches torch.argmax for finite input).
    col = jax.lax.broadcasted_iota(jnp.int32, (tb, num_classes), 1)
    max_vals = jnp.max(preds, axis=-1, keepdims=True)                       # (TB, 1)
    argmax = jnp.min(
        jnp.where(preds == max_vals, col, jnp.int32(num_classes)),
        axis=-1, keepdims=True)                                             # (TB, 1)

    # Tail-tile row validity (no wrapper-side padding; OOB rows read garbage and are masked).
    row = (jax.lax.broadcasted_iota(jnp.int32, (tb, 1), 0)
           + pl.program_id(0) * block_batch)
    valid = row < batch

    correct = jnp.where(jnp.logical_and(valid, argmax == tgt), 1.0, 0.0)    # (TB, 1) f32
    m = jnp.sum(correct)

    # Lane-dense (1, 128) store of the per-tile partial (value replicated across lanes).
    partial_ref[...] = jnp.full((1, LANES), m, dtype=jnp.float32)


def _round_up(x, m):
    return ((x + m - 1) // m) * m


def _sublane_multiple(dtype):
    # f32 -> 8, bf16 -> 16, int8/fp8 -> 32.
    return max(8, 32 // jnp.dtype(dtype).itemsize)


def _vmem_capacity_bytes():
    try:
        info = pltpu.get_tpu_info()
        cap = getattr(info, "vmem_capacity_bytes", None)
        if cap:
            return int(cap)
    except Exception:
        pass
    return 64 * 1024 * 1024  # conservative (v7x-safe) fallback


def _row_vmem_bytes(num_classes, itemsize):
    # Lane-padded preds row + lane-padded (tb, 1) int32 targets row, per buffered copy.
    return _round_up(num_classes, LANES) * itemsize + LANES * 4


def _choose_batch_tile(batch, num_classes, dtype):
    """Biggest batch tile whose double-buffered, lane-padded footprint fits the budget."""
    itemsize = jnp.dtype(dtype).itemsize
    sub = _sublane_multiple(dtype)
    budget = _vmem_capacity_bytes() // 2            # half of VMEM for the streamed buffers
    tb = budget // (2 * _row_vmem_bytes(num_classes, itemsize))
    tb = max(sub, (tb // sub) * sub)
    # Keep >= 2 tiles when the batch is big enough so both TCs get work on megacore parts.
    if batch >= 4 * sub:
        tb = min(tb, _round_up((batch + 1) // 2, sub))
    if tb >= batch:
        return batch                                # single full-extent tile (always legal)
    return tb


def accuracy_forward(preds, targets, correct_state, total_state, *, block_batch=None):
    """Mirrors Accuracy.forward: returns (m/n, new_correct, new_total)."""
    B, C = preds.shape
    itemsize = jnp.dtype(preds.dtype).itemsize
    sub = _sublane_multiple(preds.dtype)
    targets_col = targets.reshape(B, 1).astype(jnp.int32)

    if block_batch is None:
        tb = _choose_batch_tile(B, C, preds.dtype)
    else:
        tb = max(sub, (int(block_batch) // sub) * sub)
        if tb >= B:
            tb = B

    num_tiles = pl.cdiv(B, tb)

    # VMEM limit from the actual double-buffered, lane-padded footprint (+ headroom).
    cap = _vmem_capacity_bytes()
    buf_bytes = 2 * _round_up(tb, 8) * _row_vmem_bytes(C, itemsize)
    vmem_limit = min(buf_bytes + (8 << 20), cap - (8 << 20))
    vmem_limit = max(vmem_limit, 16 << 20)

    kernel = functools.partial(_accuracy_kernel, batch=B, block_batch=tb)

    partials = pl.pallas_call(
        kernel,
        out_shape=jax.ShapeDtypeStruct((1, num_tiles * LANES), jnp.float32),
        grid_spec=pltpu.PrefetchScalarGridSpec(
            num_scalar_prefetch=0,
            grid=(num_tiles,),
            in_specs=[
                pl.BlockSpec((tb, C), lambda i: (i, 0)),
                pl.BlockSpec((tb, 1), lambda i: (i, 0)),
            ],
            out_specs=pl.BlockSpec((1, LANES), lambda i: (0, i)),
        ),
        compiler_params=pltpu.CompilerParams(
            dimension_semantics=("parallel",),
            vmem_limit_bytes=int(vmem_limit),
        ),
    )(preds, targets_col)

    m = jnp.sum(partials.reshape(num_tiles, LANES)[:, 0])

    n = jnp.float32(B)
    new_correct = correct_state + m
    new_total = total_state + n
    return m / n, new_correct, new_total


def accuracy_compute(correct_state, total_state):
    """Mirrors Accuracy.compute()."""
    return correct_state.astype(jnp.float32) / total_state


def accuracy_reset():
    """Mirrors Accuracy.reset()."""
    return jnp.float32(0.0), jnp.float32(0.0)


if __name__ == "__main__":
    correct_state, total_state = accuracy_reset()
    key = jax.random.PRNGKey(0)
    k1, k2, k3, k4, k5, k6 = jax.random.split(key, 6)

    ref_correct = jnp.float32(0.0)
    ref_total = jnp.float32(0.0)

    # Case 1: tiny single-tile case (auto tile -> full extent).
    batch1, classes1 = 8, 32
    preds1 = jax.random.normal(k1, (batch1, classes1), dtype=jnp.float32)
    targets1 = jax.random.randint(k2, (batch1,), 0, classes1, dtype=jnp.int32)
    acc1, correct_state, total_state = accuracy_forward(
        preds1, targets1, correct_state, total_state)
    acc1 = jax.block_until_ready(acc1)
    ref_m1 = jnp.sum(jnp.argmax(preds1, axis=-1) == targets1).astype(jnp.float32)
    ref_correct += ref_m1
    ref_total += jnp.float32(batch1)
    assert jnp.allclose(acc1, ref_m1 / batch1), (acc1, ref_m1 / batch1)

    # Case 2: auto tile with forced >=2 tiles + ragged tail masking (B=200, no padding).
    batch2, classes2 = 200, 32
    preds2 = jax.random.normal(k3, (batch2, classes2), dtype=jnp.float32)
    targets2 = jax.random.randint(k4, (batch2,), 0, classes2, dtype=jnp.int32)
    acc2, correct_state, total_state = accuracy_forward(
        preds2, targets2, correct_state, total_state)
    acc2 = jax.block_until_ready(acc2)
    ref_m2 = jnp.sum(jnp.argmax(preds2, axis=-1) == targets2).astype(jnp.float32)
    ref_correct += ref_m2
    ref_total += jnp.float32(batch2)
    assert jnp.allclose(acc2, ref_m2 / batch2), (acc2, ref_m2 / batch2)

    # Case 3: explicit small tile (4 tiles, masked tail) on the same data.
    acc3, correct_state, total_state = accuracy_forward(
        preds2, targets2, correct_state, total_state, block_batch=64)
    acc3 = jax.block_until_ready(acc3)
    ref_correct += ref_m2
    ref_total += jnp.float32(batch2)
    assert jnp.allclose(acc3, ref_m2 / batch2), (acc3, ref_m2 / batch2)

    # Case 4: bf16 logits (halved HBM traffic path), 16-row sublane-aligned tiles + tail.
    batch4, classes4 = 50, 32
    preds4 = jax.random.normal(k5, (batch4, classes4), dtype=jnp.float32).astype(jnp.bfloat16)
    targets4 = jax.random.randint(k6, (batch4,), 0, classes4, dtype=jnp.int32)
    acc4, correct_state, total_state = accuracy_forward(
        preds4, targets4, correct_state, total_state, block_batch=16)
    acc4 = jax.block_until_ready(acc4)
    ref_m4 = jnp.sum(jnp.argmax(preds4, axis=-1) == targets4).astype(jnp.float32)
    ref_correct += ref_m4
    ref_total += jnp.float32(batch4)
    assert jnp.allclose(acc4, ref_m4 / batch4), (acc4, ref_m4 / batch4)

    # Running-state and compute() checks.
    assert jnp.allclose(correct_state, ref_correct), (correct_state, ref_correct)
    assert jnp.allclose(total_state, ref_total), (total_state, ref_total)
    assert jnp.allclose(accuracy_compute(correct_state, total_state),
                        ref_correct / ref_total)

    print("KERNEL_OK")
</pallas_src>

<mosaic_0001>
module attributes {stable_mosaic.version = 11 : i64} {
  func.func @_accuracy_kernel(%arg0: i32, %arg1: memref<8x32xf32, #tpu.memory_space<vmem>>, %arg2: memref<8x1xi32, #tpu.memory_space<vmem>>, %arg3: memref<1x128xf32, #tpu.memory_space<vmem>>) attributes {dimension_semantics = [#tpu.dimension_semantics<parallel>], iteration_bounds = array<i64: 1>, scalar_prefetch = 0 : i64, scratch_operands = 0 : i64, tpu.core_type = #tpu.core_type<tc>, window_params = [{transform_indices = @transform_0, window_bounds = array<i64: 8, 32>}, {transform_indices = @transform_1, window_bounds = array<i64: 8, 1>}, {transform_indices = @transform_2, window_bounds = array<i64: 1, 128>}]} {
    %c0 = arith.constant 0 : index
    %c0_0 = arith.constant 0 : index
    %0 = vector.load %arg1[%c0, %c0_0] : memref<8x32xf32, #tpu.memory_space<vmem>>, vector<8x32xf32>
    %c0_1 = arith.constant 0 : index
    %c0_2 = arith.constant 0 : index
    %1 = vector.load %arg2[%c0_1, %c0_2] : memref<8x1xi32, #tpu.memory_space<vmem>>, vector<8x1xi32>
    %2 = tpu.iota {dimensions = array<i32: 1>} : vector<8x32xi32>
    %cst = arith.constant dense<0xFF800000> : vector<8xf32>
    %3 = vector.multi_reduction <maximumf>, %0, %cst [1] : vector<8x32xf32> to vector<8xf32>
    %4 = vector.shape_cast %3 : vector<8xf32> to vector<8x1xf32>
    %5 = vector.broadcast %4 : vector<8x1xf32> to vector<8x32xf32>
    %6 = arith.cmpf oeq, %0, %5 : vector<8x32xf32>
    %c32_i32 = arith.constant 32 : i32
    %7 = vector.broadcast %c32_i32 : i32 to vector<8x32xi32>
    %8 = arith.select %6, %2, %7 : vector<8x32xi1>, vector<8x32xi32>
    %cst_3 = arith.constant dense<2147483647> : vector<8xi32>
    %9 = vector.multi_reduction <minsi>, %8, %cst_3 [1] : vector<8x32xi32> to vector<8xi32>
    %10 = vector.shape_cast %9 : vector<8xi32> to vector<8x1xi32>
    %11 = tpu.iota {dimensions = array<i32: 0>} : vector<8x1xi32>
    %c8_i32 = arith.constant 8 : i32
    %12 = arith.muli %arg0, %c8_i32 : i32
    %13 = vector.broadcast %12 : i32 to vector<8x1xi32>
    %14 = arith.addi %11, %13 : vector<8x1xi32>
    %c8_i32_4 = arith.constant 8 : i32
    %15 = vector.broadcast %c8_i32_4 : i32 to vector<8x1xi32>
    %16 = arith.cmpi slt, %14, %15 : vector<8x1xi32>
    %17 = arith.cmpi eq, %10, %1 : vector<8x1xi32>
    %18 = arith.andi %16, %17 : vector<8x1xi1>
    %cst_5 = arith.constant 1.000000e+00 : f32
    %cst_6 = arith.constant 0.000000e+00 : f32
    %19 = vector.broadcast %cst_5 : f32 to vector<8x1xf32>
    %20 = vector.broadcast %cst_6 : f32 to vector<8x1xf32>
    %21 = arith.select %18, %19, %20 : vector<8x1xi1>, vector<8x1xf32>
    %22 = vector.shape_cast %21 : vector<8x1xf32> to vector<1x8x1xf32>
    %cst_7 = arith.constant dense<0.000000e+00> : vector<1xf32>
    %23 = vector.multi_reduction <add>, %22, %cst_7 [1, 2] : vector<1x8x1xf32> to vector<1xf32>
    %24 = vector.shape_cast %23 : vector<1xf32> to vector<1x1x1xf32>
    %25 = vector.extract %24[0, 0, 0] : f32 from vector<1x1x1xf32>
    %26 = vector.broadcast %25 : f32 to vector<1x128xf32>
    %c0_8 = arith.constant 0 : index
    %c0_9 = arith.constant 0 : index
    %27 = vector.load %arg3[%c0_8, %c0_9] : memref<1x128xf32, #tpu.memory_space<vmem>>, vector<1x128xf32>
    tpu.vector_store %arg3[%c0_8, %c0_9], %26 {strides = array<i32>} : memref<1x128xf32, #tpu.memory_space<vmem>>, vector<1x128xf32>,
    return
  }
  func.func @transform_0(%arg0: i32) -> (i32, i32) {
    %c0_i32 = arith.constant 0 : i32
    %c0_i32_0 = arith.constant 0 : i32
    return %arg0, %c0_i32 : i32, i32
  }
  func.func @transform_1(%arg0: i32) -> (i32, i32) {
    %c0_i32 = arith.constant 0 : i32
    %c0_i32_0 = arith.constant 0 : i32
    return %arg0, %c0_i32 : i32, i32
  }
  func.func @transform_2(%arg0: i32) -> (i32, i32) {
    %c0_i32 = arith.constant 0 : i32
    %c0_i32_0 = arith.constant 0 : i32
    return %c0_i32, %arg0 : i32, i32
  }
}

</mosaic_0001>

<bundles_post_ra>
// kernel: tpu_custom_call.1
= control target key start
LH: loop header
LB: loop body
LE: loop exit
PB: predicated region body
PF: predicated region fallthrough
CT: control target
= control target key end

     0   :  { %vm16_vm0 = vcmask 261120   ;;  %s136_s0 = inlined_call_operand.vmem [shape: f32[8,32], index: 0, kind: input, shape index: {}]   ;;  %s137_s1 = inlined_call_operand.vmem [shape: s32[8,1], index: 1, kind: input, shape index: {}]   ;;  %s138_s2 = inlined_call_operand.hbm [shape: f32[1,128], index: 2, kind: output, shape index: {}]  }
   0x1   :  { %v12_v0 = vld [vmem:[%s136_s0] sm:$0xff] }
   0x2   :  { %7 = vsyncpa [#allocation3], 0  ;;  %v17_v1 = vsel %vm16_vm0, %v12_v0, -inf  ;;  %v14_v2 = vlaneseq  ;;  %v13_v17 = vld [vmem:[%s137_s1] sm:$0xff]  ;;  %vm46_vm3 = vcmask 7168   ;;  %v101_v19 = vmov 0.0  }
   0x3   :  { %18 = vmax.xlane.f32.xlu0 %v17_v1  ;;  %s102_s12 = smov [#allocation2]  }
   0x4   :  { %v15_v3 = vand.u32 127, %v14_v2  ;;  %s65_s13 = sshll.u32 %s102_s12, 4  ;;  %s66_s13 = int_to_ptr.vmem [resolvable:$true] %s65_s13 }
   0x5   :  { %s77_s1 = scalar_lea.vmem %s66_s13, 16  ;;  %s81_s15 = scalar_lea.vmem %s66_s13, 32 }
   0x6   :  { %p78_p0 = scmp.ne.s32.totalorder %s66_s13, %s77_s1  ;;  %p82_p1 = scmp.lt.s32.totalorder %s66_s13, %s66_s13 }
   0x7   :  { %p83_p2 = scmp.lt.s32.totalorder %s81_s15, %s77_s1 }
   0x9   :  { %p84_p3 = por %p83_p2, %p82_p1 }
   0xb   :  { %p85_p4 = pnand %p84_p3, %p78_p0 }
  0x90   :  { %v19_v4 = vpop.xlane.xlu0 %18 }
  0x91   :  { %vm20_vm1 = vcmp.eq.f32.partialorder %v12_v0, %v19_v4 }
  0x92   :  { %v21_v5 = vsel %vm20_vm1, %v15_v3, 32 }
  0x93   :  { %v22_v6 = vsel %vm16_vm0, %v21_v5, 2147483647 }
  0x94   :  { %v24_v7 = vshra.s32 %v22_v6, 16  ;;  %v23_v9 = vand.u32 65535, %v22_v6 }
  0x96   :  { %v26_v8 = vcvt.s32.f32 %v24_v7  ;;  %v25_v11 = vcvt.s32.f32 %v23_v9 }
  0x98   :  { %27 = vmin.xlane.f32.xlu0 %v26_v8 }
 0x125   :  { %v28_v10 = vpop.xlane.xlu0 %27 }
 0x126   :  { %vm29_vm2 = vcmp.eq.f32.partialorder %v26_v8, %v28_v10  ;;  %v34_v13 = vcvt.f32.s32 %v28_v10 }
 0x127   :  { %v30_v12 = vsel %vm29_vm2, %v25_v11, inf }
 0x128   :  { %31 = vmin.xlane.f32.xlu1 %v30_v12  ;;  %v35_v15 = vshll.u32 %v34_v13, 16 }
 0x1b5   :  { %v32_v14 = vpop.xlane.xlu1 %31 }
 0x1b6   :  { %v33_v16 = vcvt.f32.s32 %v32_v14 }
 0x1b8   :  { %v36_v18 = vadd.s32 %v35_v15, %v33_v16 }
 0x1ba   :  { %vm43_vm4 = vcmp.eq.s32.totalorder %v36_v18, %v13_v17 }
 0x1bb   :  { %v45_v20 = vsel %vm43_vm4, 1.0, %v101_v19 }
 0x1bc   :  { %v47_v21 = vsel %vm46_vm3, %v45_v20, 0.0 }
 0x1bd   :  { %48 = vadd.xlane.f32.xlu1 %v47_v21 }
 0x24a   :  { %v49_v22 = vpop.xlane.xlu1 %48 }
 0x24b   :  { %v50_v23 = vrot.slane %v49_v22, 4 }
 0x24d   :  { %v51_v24 = vadd.f32 %v50_v23, %v49_v22 }
 0x24f   :  { %v52_v25 = vrot.slane %v51_v24, 2 }
 0x251   :  { %v53_v26 = vadd.f32 %v52_v25, %v51_v24 }
 0x253   :  { %v54_v27 = vrot.slane %v53_v26, 1 }
 0x255   :  { %v55_v28 = vadd.f32 %v54_v27, %v53_v26 }
 0x257   :  { %73 = vpush %v55_v28 }
 0x288   :  { %s74_s14 = spop %73 }
 0x289   :  { %v57_v29 = vstv %s74_s14 }
 0x28a   :  { %58 = vst [vmem:[#allocation2] sm:$0x1] %v57_v29 }
 0x28b   :  { %88 = shalt.err (!%p85_p4)
}
 0x28c   :  { %s89_s18 = scalar_lea.hbm %s138_s2, 16 }
 0x28d   :  { %p90_p5 = scmp.ne.s32.totalorder %s138_s2, %s89_s18  ;;  %p93_p6 = scmp.lt.u32.totalorder %s89_s18, %s138_s2 }
 0x28f   :  { %p95_p7 = pnand %p93_p6, %p90_p5 }
 0x291   :  { %98 = shalt.err (!%p95_p7)
}
 0x292   :  { %68 = dma.vmem_to_hbm [thread:$0]  %s66_s13, 16, %s138_s2, [#allocation3]  }
 0x293   :  { %99 = dma.done.wait [#allocation3], 16  }
 0x294   :  { %100 = vsyncadd [#allocation3], 4294967280 }
 0x295   :  { %72 = vsyncpa [#allocation3], 1 }

</bundles_post_ra>
